<compile_context>
chip_gen: v7x
topology: tpu7x:2x2x1
jax: 0.10.0
libtpu: 0.0.40
codegen_flags: <defaults>
</compile_context>

<pallas_src>
import functools
import numpy as np
import jax
import jax.numpy as jnp
from jax.experimental import pallas as pl
from jax.experimental.pallas import tpu as pltpu


_COMPUTE_DTYPE = jnp.bfloat16   # MXU operand dtype; accumulation is always f32.


# ---------------------------------------------------------------------------
# Generation-aware VMEM / tiling budgets
# ---------------------------------------------------------------------------
def _tpu_vmem_capacity_bytes():
    try:
        return int(pltpu.get_tpu_info().vmem_capacity_bytes)
    except Exception:
        return 64 << 20          # conservative (v7x-sized) fallback


_VMEM_CAP = _tpu_vmem_capacity_bytes()
_VMEM_BUDGET = min(int(_VMEM_CAP * 0.85), 120 << 20)       # leave compiler headroom
_ROW_TILE_TARGET = 1024 if _VMEM_CAP >= (100 << 20) else 512


def _vmem_limit(need_bytes):
    hard = int(_VMEM_CAP * 0.95)
    return int(min(max(need_bytes + (8 << 20), 32 << 20), hard))


def _row_tile(M, target):
    """Full block for small M, otherwise a multiple of 128 rows with >=2 blocks."""
    if M <= 512:
        return M
    tm = min(target, M // 2)
    return max(128, (tm // 128) * 128)


# ---------------------------------------------------------------------------
# Linear projection kernel (MLP): (M, K) @ (K, E) + b
# ---------------------------------------------------------------------------
def _linear_kernel(x_ref, w_ref, b_ref, o_ref):
    acc = jnp.dot(x_ref[...], w_ref[...], preferred_element_type=jnp.float32)
    acc = acc + b_ref[...]
    o_ref[...] = acc.astype(o_ref.dtype)


def linear_pallas(x2d, w, b, *, out_dtype=jnp.bfloat16):
    """Tiled (M, K) @ (K, E) + b.  bf16 operands, f32 accumulation."""
    M, K = x2d.shape
    E = w.shape[1]
    out_it = jnp.dtype(out_dtype).itemsize

    tm = _row_tile(M, _ROW_TILE_TARGET)

    def need(t):   # every BlockSpec operand double-buffered
        return (2 * t * K * x2d.dtype.itemsize + 2 * K * E * w.dtype.itemsize
                + 2 * E * 4 + 2 * t * E * out_it)

    while tm > 128 and need(tm) + (4 << 20) > _VMEM_BUDGET:
        tm = max(128, (tm // 2 // 128) * 128)

    grid = (pl.cdiv(M, tm),)
    cost = pl.CostEstimate(
        flops=2 * M * K * E, transcendentals=0,
        bytes_accessed=M * K * x2d.dtype.itemsize + K * E * w.dtype.itemsize
        + M * E * out_it + E * 4)

    return pl.pallas_call(
        _linear_kernel,
        out_shape=jax.ShapeDtypeStruct((M, E), out_dtype),
        grid_spec=pltpu.PrefetchScalarGridSpec(
            num_scalar_prefetch=0,
            grid=grid,
            in_specs=[
                pl.BlockSpec((tm, K), lambda i: (i, 0)),
                pl.BlockSpec((K, E), lambda i: (0, 0)),
                pl.BlockSpec((1, E), lambda i: (0, 0)),
            ],
            out_specs=pl.BlockSpec((tm, E), lambda i: (i, 0)),
        ),
        compiler_params=pltpu.CompilerParams(
            dimension_semantics=("parallel",),
            vmem_limit_bytes=_vmem_limit(need(tm))),
        cost_estimate=cost,
    )(x2d, w, b.reshape(1, E).astype(jnp.float32))


# ---------------------------------------------------------------------------
# Fused "concat + 1x1 conv (BN folded) + ReLU".
# out = relu([x4|x3|x2|x1] @ wf + bf) as four accumulated dots; the 4E concat
# is never materialized.  Weight is (4, E, E) so each operand is tile-aligned.
# ---------------------------------------------------------------------------
def _fuse_kernel(x4_ref, x3_ref, x2_ref, x1_ref, w_ref, b_ref, o_ref):
    acc = jnp.dot(x4_ref[...], w_ref[0], preferred_element_type=jnp.float32)
    acc = acc + jnp.dot(x3_ref[...], w_ref[1], preferred_element_type=jnp.float32)
    acc = acc + jnp.dot(x2_ref[...], w_ref[2], preferred_element_type=jnp.float32)
    acc = acc + jnp.dot(x1_ref[...], w_ref[3], preferred_element_type=jnp.float32)
    acc = acc + b_ref[...]
    o_ref[...] = jnp.maximum(acc, 0.0).astype(o_ref.dtype)


def fuse_pallas(x4, x3, x2, x1, wf, bf, *, out_dtype=jnp.bfloat16):
    M, E = x1.shape
    it = x1.dtype.itemsize
    out_it = jnp.dtype(out_dtype).itemsize

    tm = _row_tile(M, _ROW_TILE_TARGET)

    def need(t):   # every BlockSpec operand double-buffered
        return (4 * 2 * t * E * it + 2 * 4 * E * E * wf.dtype.itemsize
                + 2 * E * 4 + 2 * t * E * out_it)

    while tm > 128 and need(tm) + (4 << 20) > _VMEM_BUDGET:
        tm = max(128, (tm // 2 // 128) * 128)

    grid = (pl.cdiv(M, tm),)
    cost = pl.CostEstimate(
        flops=2 * M * (4 * E) * E, transcendentals=0,
        bytes_accessed=4 * M * E * it + 4 * E * E * wf.dtype.itemsize
        + M * E * out_it + E * 4)

    return pl.pallas_call(
        _fuse_kernel,
        out_shape=jax.ShapeDtypeStruct((M, E), out_dtype),
        grid_spec=pltpu.PrefetchScalarGridSpec(
            num_scalar_prefetch=0,
            grid=grid,
            in_specs=[pl.BlockSpec((tm, E), lambda i: (i, 0)) for _ in range(4)]
            + [pl.BlockSpec((4, E, E), lambda i: (0, 0, 0)),
               pl.BlockSpec((1, E), lambda i: (0, 0))],
            out_specs=pl.BlockSpec((tm, E), lambda i: (i, 0)),
        ),
        compiler_params=pltpu.CompilerParams(
            dimension_semantics=("parallel",),
            vmem_limit_bytes=_vmem_limit(need(tm))),
        cost_estimate=cost,
    )(x4, x3, x2, x1, wf, bf.reshape(1, E).astype(jnp.float32))


# ---------------------------------------------------------------------------
# Bilinear resize (align_corners=False), channels on lanes.
#   - H-lerp: two dynamically indexed source rows (SMEM index tables) lerped
#     on the VPU.
#   - W-lerp: one MXU matmul per output row against a static (out_w, W_in)
#     interpolation matrix.
#   - Grid: (N, out_h / TH); one resident source slab per batch element.
# ---------------------------------------------------------------------------
def _interp_coeffs(out_size, in_size):
    """PyTorch F.interpolate(mode='bilinear', align_corners=False) coefficients."""
    out_size, in_size = int(out_size), int(in_size)
    scale = in_size / out_size
    src = (np.arange(out_size, dtype=np.float64) + 0.5) * scale - 0.5
    src = np.maximum(src, 0.0)                       # PyTorch clamps negative src
    i0 = np.clip(np.floor(src).astype(np.int32), 0, in_size - 1)
    i1 = np.minimum(i0 + 1, in_size - 1).astype(np.int32)
    lam1 = (src - i0).astype(np.float32)
    lam0 = (1.0 - lam1).astype(np.float32)
    return i0, i1, lam0, lam1


def _interp_matrix(out_size, in_size):
    """(out_size, in_size) interpolation matrix (rows sum to 1, <=2 nonzeros)."""
    i0, i1, l0, l1 = _interp_coeffs(out_size, in_size)
    m = np.zeros((out_size, in_size), np.float32)
    rows = np.arange(out_size)
    np.add.at(m, (rows, i0), l0)
    np.add.at(m, (rows, i1), l1)
    return m


def _resize_row_block(out_h, out_w, E, itemsize, max_rows=16, max_bytes=2 << 20):
    """Largest divisor of out_h that is <= max_rows and keeps the out block small."""
    cap = max(1, min(max_rows, max_bytes // max(1, out_w * E * itemsize)))
    th = 1
    for d in range(1, out_h + 1):
        if out_h % d == 0 and d <= cap:
            th = d
    return th


def _resize_kernel(ih0_ref, ih1_ref,      # SMEM int32 source-row tables (out_h,)
                   x_ref,                  # (H_in, W_in, E) full source slab
                   rw_ref,                 # (out_w, W_in) f32 W-interp matrix
                   lh_ref,                 # (out_h, 1) f32 weight of row ih1
                   o_ref,                  # (TH, out_w, E)
                   *, th):
    hb = pl.program_id(1)
    rw = rw_ref[...]                                   # resident, hoisted
    for t in range(th):                                # static unroll, TH small
        r = hb * th + t
        i0 = ih0_ref[r]
        i1 = ih1_ref[r]
        a = lh_ref[pl.ds(r, 1), :]                     # (1, 1) lerp weight
        r0 = x_ref[i0].astype(jnp.float32)             # (W_in, E)
        r1 = x_ref[i1].astype(jnp.float32)
        row = (1.0 - a) * r0 + a * r1                  # H-lerp on the VPU
        o_ref[t] = jnp.dot(rw, row,                    # W-lerp on the MXU
                           preferred_element_type=jnp.float32).astype(o_ref.dtype)


def resize_bilinear_pallas(x, out_h, out_w):
    """x: (N, H, W, E) -> (N, out_h, out_w, E); PyTorch bilinear, align_corners=False."""
    N, H, Wi, E = x.shape
    out_h, out_w = int(out_h), int(out_w)
    if (H, Wi) == (out_h, out_w):
        return x

    ih0, ih1, _, lh1 = _interp_coeffs(out_h, H)
    rw = jnp.asarray(_interp_matrix(out_w, Wi))            # (out_w, W_in) f32
    lh = jnp.asarray(lh1.reshape(out_h, 1))                # (out_h, 1)  f32

    th = _resize_row_block(out_h, out_w, E, x.dtype.itemsize)
    grid = (N, out_h // th)

    slab = H * Wi * E * x.dtype.itemsize
    out_blk = th * out_w * E * x.dtype.itemsize
    need = 2 * slab + 2 * rw.size * 4 + 2 * lh.size * 4 + 2 * out_blk
    cost = pl.CostEstimate(
        flops=2 * N * out_h * out_w * Wi * E + 3 * N * out_h * Wi * E,
        transcendentals=0,
        bytes_accessed=N * (H * Wi + out_h * out_w) * E * x.dtype.itemsize)

    kernel = functools.partial(_resize_kernel, th=th)
    return pl.pallas_call(
        kernel,
        out_shape=jax.ShapeDtypeStruct((N, out_h, out_w, E), x.dtype),
        grid_spec=pltpu.PrefetchScalarGridSpec(
            num_scalar_prefetch=2,           # ih0, ih1 int32 tables -> SMEM
            grid=grid,
            in_specs=[
                pl.BlockSpec((None, H, Wi, E), lambda n, i, i0, i1: (n, 0, 0, 0)),
                pl.BlockSpec((out_w, Wi), lambda n, i, i0, i1: (0, 0)),
                pl.BlockSpec((out_h, 1), lambda n, i, i0, i1: (0, 0)),
            ],
            out_specs=pl.BlockSpec((None, th, out_w, E),
                                   lambda n, i, i0, i1: (n, i, 0, 0)),
        ),
        compiler_params=pltpu.CompilerParams(
            dimension_semantics=("parallel", "parallel"),
            vmem_limit_bytes=_vmem_limit(need)),
        cost_estimate=cost,
    )(jnp.asarray(ih0), jnp.asarray(ih1), x, rw, lh)


# ---------------------------------------------------------------------------
# Parameters (Linear proj weights + BN-folded 1x1 fuse conv)
# ---------------------------------------------------------------------------
def make_params(key, in_channels, embed_dim):
    ks = jax.random.split(key, 12)
    p = {}
    for idx, cin in enumerate(in_channels, start=1):
        # nn.Linear(cin, embed): weight (E, cin), bias (E,)
        w = 0.02 * jax.random.normal(ks[idx - 1], (embed_dim, cin), jnp.float32)
        b = 0.01 * jax.random.normal(ks[idx + 3], (embed_dim,), jnp.float32)
        p[f"w{idx}"] = jnp.transpose(w)            # stored (cin, E)
        p[f"b{idx}"] = b
    # linear_fuse: Conv2d(4E, E, 1, bias=False) + SyncBN + ReLU  (BN folded here)
    conv_w = 0.02 * jax.random.normal(ks[8], (embed_dim, 4 * embed_dim), jnp.float32)
    gamma = 1.0 + 0.1 * jax.random.normal(ks[9], (embed_dim,), jnp.float32)
    beta = 0.1 * jax.random.normal(ks[10], (embed_dim,), jnp.float32)
    run_mean = 0.05 * jax.random.normal(ks[11], (embed_dim,), jnp.float32)
    run_var = jnp.abs(1.0 + 0.1 * jax.random.normal(ks[0], (embed_dim,), jnp.float32))
    eps = 1e-5
    scale = gamma / jnp.sqrt(run_var + eps)
    wf = jnp.transpose(conv_w * scale[:, None])              # (4E, E)
    p["wf"] = wf.reshape(4, embed_dim, embed_dim)            # (4, E, E): [c4,c3,c2,c1]
    p["bf"] = beta - run_mean * scale
    return p


# ---------------------------------------------------------------------------
# FANNeck forward (Pallas) and a pure-JAX mirror reference
# ---------------------------------------------------------------------------
def fan_neck_forward(params, c1, c2, c3, c4):
    """Inputs/outputs NCHW (PyTorch convention).  Inference mode (Dropout2d = id)."""
    cdt = _COMPUTE_DTYPE

    def proj(x_nchw, w, b):
        N, C, H, W = x_nchw.shape
        x = jnp.transpose(x_nchw, (0, 2, 3, 1)).reshape(N * H * W, C).astype(cdt)
        y = linear_pallas(x, w.astype(cdt), b, out_dtype=cdt)
        return y.reshape(N, H, W, -1)

    n, _, H1, W1 = c1.shape
    E = params["b1"].shape[0]

    r4 = resize_bilinear_pallas(proj(c4, params["w4"], params["b4"]), H1, W1)
    r3 = resize_bilinear_pallas(proj(c3, params["w3"], params["b3"]), H1, W1)
    r2 = resize_bilinear_pallas(proj(c2, params["w2"], params["b2"]), H1, W1)
    p1 = proj(c1, params["w1"], params["b1"])

    M = n * H1 * W1
    y = fuse_pallas(r4.reshape(M, E), r3.reshape(M, E), r2.reshape(M, E),
                    p1.reshape(M, E),
                    params["wf"].astype(cdt), params["bf"], out_dtype=cdt)
    out = y.reshape(n, H1, W1, E)
    # nn.Dropout2d(0.1) is identity at inference.  The bf16->f32 cast is fused
    # by XLA into the NHWC->NCHW output transpose.
    return jnp.transpose(out, (0, 3, 1, 2)).astype(jnp.float32)


def fan_neck_reference(params, c1, c2, c3, c4):
    """Pure-JAX mirror (same bf16 cast points, f32 accumulation) for checking."""
    cdt = _COMPUTE_DTYPE
    f32 = lambda a: a.astype(jnp.float32)

    def proj(x_nchw, w, b):
        N, C, H, W = x_nchw.shape
        x = jnp.transpose(x_nchw, (0, 2, 3, 1)).reshape(N * H * W, C).astype(cdt)
        y = jnp.dot(x, w.astype(cdt), preferred_element_type=jnp.float32) + b
        return y.astype(cdt).reshape(N, H, W, -1)

    def resize(x, Ho, Wo):
        N, H, W, E = x.shape
        if (H, W) == (Ho, Wo):
            return x
        ih0, ih1, _, lh1 = _interp_coeffs(Ho, H)
        rw = jnp.asarray(_interp_matrix(Wo, W))
        xf = f32(x)
        rows = ((1.0 - lh1)[None, :, None, None] * xf[:, ih0]
                + lh1[None, :, None, None] * xf[:, ih1])          # (N, Ho, W, E)
        out = jnp.einsum('ow,nhwe->nhoe', rw, rows)               # (N, Ho, Wo, E)
        return out.astype(cdt)

    n, _, H1, W1 = c1.shape
    E = params["b1"].shape[0]
    r4 = resize(proj(c4, params["w4"], params["b4"]), H1, W1)
    r3 = resize(proj(c3, params["w3"], params["b3"]), H1, W1)
    r2 = resize(proj(c2, params["w2"], params["b2"]), H1, W1)
    p1 = proj(c1, params["w1"], params["b1"])
    cat = jnp.concatenate([r4, r3, r2, p1], axis=-1).reshape(n * H1 * W1, 4 * E)
    wf2 = params["wf"].reshape(4 * E, E).astype(cdt)
    y = jnp.maximum(jnp.dot(cat, wf2, preferred_element_type=jnp.float32)
                    + params["bf"], 0.0)
    y = y.astype(cdt)                                             # mirror fuse output dtype
    return jnp.transpose(y.reshape(n, H1, W1, E), (0, 3, 1, 2)).astype(jnp.float32)


if __name__ == "__main__":
    # Small synthetic shapes consistent with FANNeck (feature_strides 4/8/16/32).
    in_channels = [4, 8, 16, 32]
    embed_dim = 32
    N = 2
    H1, W1 = 16, 16

    key = jax.random.PRNGKey(0)
    kp, k1, k2, k3, k4 = jax.random.split(key, 5)
    params = make_params(kp, in_channels, embed_dim)

    c1 = jax.random.normal(k1, (N, in_channels[0], H1, W1), jnp.float32)
    c2 = jax.random.normal(k2, (N, in_channels[1], H1 // 2, W1 // 2), jnp.float32)
    c3 = jax.random.normal(k3, (N, in_channels[2], H1 // 4, W1 // 4), jnp.float32)
    c4 = jax.random.normal(k4, (N, in_channels[3], H1 // 8, W1 // 8), jnp.float32)

    out = jax.block_until_ready(fan_neck_forward(params, c1, c2, c3, c4))
    ref = fan_neck_reference(params, c1, c2, c3, c4)

    assert out.shape == (N, embed_dim, H1, W1), out.shape
    max_err = float(jnp.max(jnp.abs(out - ref)))
    assert jnp.allclose(out, ref, rtol=5e-3, atol=5e-3), f"mismatch, max_err={max_err}"

    print("KERNEL_OK")
</pallas_src>

<mosaic_0001>
module attributes {stable_mosaic.version = 11 : i64} {
  func.func @_linear_kernel(%arg0: i32, %arg1: memref<8x32xbf16, #tpu.memory_space<vmem>>, %arg2: memref<32x32xbf16, #tpu.memory_space<vmem>>, %arg3: memref<1x32xf32, #tpu.memory_space<vmem>>, %arg4: memref<8x32xbf16, #tpu.memory_space<vmem>>) attributes {dimension_semantics = [#tpu.dimension_semantics<parallel>], iteration_bounds = array<i64: 1>, scalar_prefetch = 0 : i64, scratch_operands = 0 : i64, tpu.core_type = #tpu.core_type<tc>, window_params = [{transform_indices = @transform_0, window_bounds = array<i64: 8, 32>}, {pipeline_mode = #tpu.pipeline_mode<synchronous>, transform_indices = @transform_1, window_bounds = array<i64: 32, 32>}, {pipeline_mode = #tpu.pipeline_mode<synchronous>, transform_indices = @transform_2, window_bounds = array<i64: 1, 32>}, {transform_indices = @transform_3, window_bounds = array<i64: 8, 32>}]} {
    %c0 = arith.constant 0 : index
    %c0_0 = arith.constant 0 : index
    %0 = vector.load %arg1[%c0, %c0_0] : memref<8x32xbf16, #tpu.memory_space<vmem>>, vector<8x32xbf16>
    %c0_1 = arith.constant 0 : index
    %c0_2 = arith.constant 0 : index
    %1 = vector.load %arg2[%c0_1, %c0_2] : memref<32x32xbf16, #tpu.memory_space<vmem>>, vector<32x32xbf16>
    %cst = arith.constant dense<0.000000e+00> : vector<8x32xf32>
    %2 = tpu.matmul %0, %1, %cst {dimension_numbers = #tpu.dot_dimension_numbers<[1], [0], [0], [1], [0, 0, 1, 1], [], []>} : vector<8x32xbf16>, vector<32x32xbf16>, vector<8x32xf32> -> vector<8x32xf32>
    %c0_3 = arith.constant 0 : index
    %c0_4 = arith.constant 0 : index
    %3 = vector.load %arg3[%c0_3, %c0_4] : memref<1x32xf32, #tpu.memory_space<vmem>>, vector<1x32xf32>
    %4 = vector.broadcast %3 : vector<1x32xf32> to vector<8x32xf32>
    %5 = arith.addf %2, %4 : vector<8x32xf32>
    %6 = arith.truncf %5 : vector<8x32xf32> to vector<8x32xbf16>
    %c0_5 = arith.constant 0 : index
    %c0_6 = arith.constant 0 : index
    %7 = vector.load %arg4[%c0_5, %c0_6] : memref<8x32xbf16, #tpu.memory_space<vmem>>, vector<8x32xbf16>
    tpu.vector_store %arg4[%c0_5, %c0_6], %6 {strides = array<i32>} : memref<8x32xbf16, #tpu.memory_space<vmem>>, vector<8x32xbf16>,
    return
  }
  func.func @transform_0(%arg0: i32) -> (i32, i32) {
    %c0_i32 = arith.constant 0 : i32
    %c0_i32_0 = arith.constant 0 : i32
    return %arg0, %c0_i32 : i32, i32
  }
  func.func @transform_1(%arg0: i32) -> (i32, i32) {
    %c0_i32 = arith.constant 0 : i32
    %c0_i32_0 = arith.constant 0 : i32
    %c0_i32_1 = arith.constant 0 : i32
    return %c0_i32, %c0_i32_0 : i32, i32
  }
  func.func @transform_2(%arg0: i32) -> (i32, i32) {
    %c0_i32 = arith.constant 0 : i32
    %c0_i32_0 = arith.constant 0 : i32
    %c0_i32_1 = arith.constant 0 : i32
    return %c0_i32, %c0_i32_0 : i32, i32
  }
  func.func @transform_3(%arg0: i32) -> (i32, i32) {
    %c0_i32 = arith.constant 0 : i32
    %c0_i32_0 = arith.constant 0 : i32
    return %arg0, %c0_i32 : i32, i32
  }
}

</mosaic_0001>

<bundles_post_ra>
// kernel: tpu_custom_call.1
= control target key start
LH: loop header
LB: loop body
LE: loop exit
PB: predicated region body
PF: predicated region fallthrough
CT: control target
= control target key end

     0   :  { %8 = vsyncpa [#allocation3], 0  ;;  %s298_s0 = inlined_call_operand.hbm [shape: bf16[8,32], index: 0, kind: input, shape index: {}]   ;;  %s299_s1 = inlined_call_operand.hbm [shape: bf16[32,32], index: 1, kind: input, shape index: {}]   ;;  %s300_s2 = inlined_call_operand.vmem [shape: f32[1,32], index: 2, kind: input, shape index: {}]   ;;  %s301_s3 = inlined_call_operand.hbm [shape: bf16[8,32], index: 3, kind: output, shape index: {}]  }
   0x1   :  { %9 = vsyncpa [#allocation6], 0 }
   0x2   :  { %10 = vsyncpa [#allocation4], 0  ;;  %s225_s12 = smov [#allocation2]   ;;  %s226_s14 = smov [#allocation5]  }
   0x3   :  { %s17_s13 = sshll.u32 %s225_s12, 4  ;;  %s26_s15 = sshll.u32 %s226_s14, 4  ;;  %s18_s13 = int_to_ptr.vmem [resolvable:$true] %s17_s13  ;;  %s252_s15 = int_to_ptr.vmem [resolvable:$true] %s26_s15 }
   0x4   :  { %s153_s18 = scalar_lea.hbm %s298_s0, 64 }
   0x5   :  { %p154_p0 = scmp.ne.s32.totalorder %s298_s0, %s153_s18  ;;  %p157_p1 = scmp.lt.u32.totalorder %s153_s18, %s298_s0 }
   0x7   :  { %p159_p2 = pnand %p157_p1, %p154_p0 }
   0x9   :  { %162 = shalt.err (!%p159_p2)
}
   0xa   :  { %s163_s23 = scalar_lea.vmem %s18_s13, 64  ;;  %p168_p4 = scmp.lt.s32.totalorder %s18_s13, %s18_s13 }
   0xb   :  { %p164_p3 = scmp.ne.s32.totalorder %s18_s13, %s163_s23  ;;  %p169_p5 = scmp.lt.s32.totalorder %s163_s23, %s163_s23 }
   0xd   :  { %p170_p6 = por %p169_p5, %p168_p4 }
   0xf   :  { %p171_p7 = pnand %p170_p6, %p164_p3 }
  0x11   :  { %174 = shalt.err (!%p171_p7)
}
  0x12   :  { %20 = dma.hbm_to_vmem [thread:$0]  %s298_s0, 64, %s18_s13, [#allocation3]  }
  0x13   :  { %s175_s28 = scalar_lea.hbm %s299_s1, 256 }
  0x14   :  { %p176_p8 = scmp.ne.s32.totalorder %s299_s1, %s175_s28  ;;  %p179_p9 = scmp.lt.u32.totalorder %s175_s28, %s299_s1 }
  0x16   :  { %p181_p10 = pnand %p179_p9, %p176_p8 }
  0x18   :  { %184 = shalt.err (!%p181_p10)
}
  0x19   :  { %s185_s6 = scalar_lea.vmem %s252_s15, 256  ;;  %p190_p12 = scmp.lt.s32.totalorder %s252_s15, %s252_s15 }
  0x1a   :  { %p186_p11 = scmp.ne.s32.totalorder %s252_s15, %s185_s6  ;;  %p191_p13 = scmp.lt.s32.totalorder %s185_s6, %s185_s6 }
  0x1c   :  { %p192_p0 = por %p191_p13, %p190_p12 }
  0x1e   :  { %p193_p1 = pnand %p192_p0, %p186_p11 }
  0x20   :  { %196 = shalt.err (!%p193_p1)
}
  0x21   :  { %s227_s0 = smov 64   ;;  %s228_s7 = smov 4  }
  0x22   :  { %32 = dma.hbm_to_vmem [thread:$0]  %s299_s1, 256, %s252_s15, [#allocation6], %s227_s0, %s227_s0, %s228_s7  }
  0x23   :  { %219 = dma.done.wait [#allocation3], 64  }
  0x24   :  { %220 = vsyncadd [#allocation3], 4294967232 }
  0x25   :  { %221 = dma.done.wait [#allocation6], 256  }
  0x26   :  { %222 = vsyncadd [#allocation6], 4294967040  ;;  %v229_v0 = vmov 0.0   ;;  %vm230_vm0 = vmmov 0   ;;  %v151_v1 = vld [vmem:[#allocation5] sm:$0xff]   ;;  %v152_v2 = vld [vmem:[#allocation5 + $0x8] sm:$0xff]  }
  0x27   :  { %136 = vmatprep.subr.bf16.mxu0 %v229_v0  ;;  %140 = vmatprep.mubr.msk.bf16.mxu0 %vm230_vm0, %v229_v0  ;;  %v42_v3 = vld [vmem:[#allocation2] sm:$0xf]  ;;  %vm66_vm1 = vcmask 261120   ;;  %s231_s1 = smov [#allocation7]   ;;  %vm111_vm2 = vcmask 257024  }
  0x28   :  { %137 = vmatpush3.bf16.msra.mxu0 %v151_v1  ;;  %v129_v4 = vld [vmem:[%s300_s2] ss:$0 sm:$0xff]  ;;  %s119_s12 = sshll.u32 %s231_s1, 4  ;;  %s120_s12 = int_to_ptr.vmem [resolvable:$true] %s119_s12 }
  0x29   :  { %138 = vmatprep.subr.bf16.mxu0 %v229_v0  ;;  %s197_s13 = scalar_lea.vmem %s120_s12, 64  ;;  %p202_p3 = scmp.lt.s32.totalorder %s120_s12, %s120_s12 }
  0x2a   :  { %p198_p2 = scmp.ne.s32.totalorder %s120_s12, %s197_s13  ;;  %p203_p4 = scmp.lt.s32.totalorder %s197_s13, %s197_s13 }
  0x2c   :  { %139 = vmatpush3.bf16.msra.mxu0 %v152_v2  ;;  %p204_p5 = por %p203_p4, %p202_p3 }
  0x2e   :  { %p205_p6 = pnand %p204_p5, %p198_p2 }
  0x2f   :  { %141 = vmatmul.mubr.msk.bf16.vlgmr.msra.gmra.mrb[0].mxu0 %vm66_vm1, %v42_v3 }
 0x102   :  { %v104_v5 = vpop.f32.mrb[0].mxu0 }
 0x103   :  { %v105_v6 = vadd.f32 %v129_v4, %v104_v5  ;;  %v142_v7 = vpop.f32.mrb[1].mxu0 }
 0x104   :  { %v107_v8 = vpop.f32.mrb[2].mxu0 }
 0x105   :  { %v110_v9 = vpack.c.bf16 %v105_v6, %v105_v6  ;;  %v143_v10 = vpop.f32.mrb[3].mxu0 }
 0x107   :  { %112 = vst.msk [vmem:[#allocation7] sm:$0xf] %vm111_vm2, %v110_v9 }
 0x108   :  { %208 = shalt.err (!%p205_p6)
}
 0x109   :  { %s209_s15 = scalar_lea.hbm %s301_s3, 64 }
 0x10a   :  { %p210_p7 = scmp.ne.s32.totalorder %s301_s3, %s209_s15  ;;  %p213_p8 = scmp.lt.u32.totalorder %s209_s15, %s301_s3 }
 0x10c   :  { %p215_p9 = pnand %p213_p8, %p210_p7 }
 0x10e   :  { %218 = shalt.err (!%p215_p9)
}
 0x10f   :  { %122 = dma.vmem_to_hbm [thread:$0]  %s120_s12, 64, %s301_s3, [#allocation4]  }
 0x110   :  { %223 = dma.done.wait [#allocation4], 64  }
 0x111   :  { %224 = vsyncadd [#allocation4], 4294967232 }
 0x112   :  { %126 = vsyncpa [#allocation3], 1 }
 0x113   :  { %127 = vsyncpa [#allocation6], 1 }
 0x114   :  { %128 = vsyncpa [#allocation4], 1 }

</bundles_post_ra>
